<compile_context>
chip_gen: v7x
topology: tpu7x:2x2x1
jax: 0.10.0
libtpu: 0.0.40
codegen_flags: <defaults>
</compile_context>

<pallas_src>
import math

import jax
import jax.numpy as jnp
from jax.experimental import pallas as pl
from jax.experimental.pallas import tpu as pltpu


def _copy_rows_kernel(x_ref, o_ref):
    # Full-width, lane-dense copy of one (tile_r, a*b) row tile.
    o_ref[...] = x_ref[...]


def _pick_row_tile(rows, ab, itemsize):
    # Sublane packing factor: 8 rows for 32-bit, 16 for 16-bit, 32 for 8-bit.
    pack = max(8, 32 // max(1, itemsize))
    # In+out tile payload budget per pipeline step (~8 MiB => ~16 MiB VMEM when
    # double-buffered) — big enough to amortize the ~0.35 us/step grid overhead,
    # small enough to leave headroom inside v7x's 64 MiB physical VMEM.
    budget = 8 * 1024 * 1024
    max_rows = max(pack, budget // max(1, 2 * ab * itemsize))
    max_rows = max(pack, (max_rows // pack) * pack)
    # No point in a tile larger than the (pack-rounded) row count.
    cap = min(max_rows, ((rows + pack - 1) // pack) * pack)
    # Largest power-of-two multiple of `pack` that fits the cap.
    t = pack
    while t * 2 <= cap:
        t *= 2
    return t


def split_last_axis_pallas(x, a, b):
    """Pallas equivalent of SplitLastAxis.forward: (..., a*b) -> (..., a, b)."""
    assert x.shape[-1] == a * b, (x.shape, a, b)
    lead = x.shape[:-1]
    ab = a * b
    rows = math.prod(lead)  # math.prod(()) == 1

    # Leading-dim flatten is a metadata-only reshape done outside the kernel.
    x2 = x.reshape(rows, ab)
    tile_r = _pick_row_tile(rows, ab, x.dtype.itemsize)

    out2 = pl.pallas_call(
        _copy_rows_kernel,
        out_shape=jax.ShapeDtypeStruct((rows, ab), x.dtype),
        grid=(pl.cdiv(rows, tile_r),),
        in_specs=[pl.BlockSpec((tile_r, ab), lambda i: (i, 0))],
        out_specs=pl.BlockSpec((tile_r, ab), lambda i: (i, 0)),
        compiler_params=pltpu.CompilerParams(
            # Pure HBM-bound streaming; independent row tiles.
            # TODO(synk): on v7x, pltpu.CORE_PARALLEL (or a core_map mesh) would
            # shard this row axis across both TensorCores for up to ~2x.
            dimension_semantics=("parallel",),
            vmem_limit_bytes=32 * 1024 * 1024,
        ),
    )(x2)

    # The actual last-axis split: metadata-only reshape of a contiguous array.
    result = out2.reshape(lead + (a, b))
    assert result.shape[-2:] == (a, b)
    return result


if __name__ == "__main__":
    # Shapes consistent with the module's use in lizrd: split hidden=128 into
    # (heads=4, dhead=32) on a (batch=2, seq=8, hidden=128) activation.
    B, L, A, Bsz = 2, 8, 4, 32
    key = jax.random.PRNGKey(0)
    x = jax.random.normal(key, (B, L, A * Bsz), dtype=jnp.float32)

    out = split_last_axis_pallas(x, A, Bsz)
    out = jax.block_until_ready(out)

    ref = x.reshape(x.shape[:-1] + (A, Bsz))  # PyTorch .view semantics
    ok = out.shape == (B, L, A, Bsz) and bool(jnp.array_equal(out, ref))

    if ok:
        print("KERNEL_OK")
</pallas_src>

<mosaic_0001>
module attributes {stable_mosaic.version = 11 : i64} {
  func.func @_copy_rows_kernel(%arg0: i32, %arg1: memref<16x128xf32, #tpu.memory_space<vmem>>, %arg2: memref<16x128xf32, #tpu.memory_space<vmem>>) attributes {dimension_semantics = [#tpu.dimension_semantics<parallel>], iteration_bounds = array<i64: 1>, scalar_prefetch = 0 : i64, scratch_operands = 0 : i64, tpu.core_type = #tpu.core_type<tc>, window_params = [{transform_indices = @transform_0, window_bounds = array<i64: 16, 128>}, {transform_indices = @transform_1, window_bounds = array<i64: 16, 128>}]} {
    %c0 = arith.constant 0 : index
    %c0_0 = arith.constant 0 : index
    %0 = vector.load %arg1[%c0, %c0_0] : memref<16x128xf32, #tpu.memory_space<vmem>>, vector<16x128xf32>
    %c0_1 = arith.constant 0 : index
    %c0_2 = arith.constant 0 : index
    %1 = vector.load %arg2[%c0_1, %c0_2] : memref<16x128xf32, #tpu.memory_space<vmem>>, vector<16x128xf32>
    tpu.vector_store %arg2[%c0_1, %c0_2], %0 {strides = array<i32>} : memref<16x128xf32, #tpu.memory_space<vmem>>, vector<16x128xf32>,
    return
  }
  func.func @transform_0(%arg0: i32) -> (i32, i32) {
    %c0_i32 = arith.constant 0 : i32
    %c0_i32_0 = arith.constant 0 : i32
    return %arg0, %c0_i32 : i32, i32
  }
  func.func @transform_1(%arg0: i32) -> (i32, i32) {
    %c0_i32 = arith.constant 0 : i32
    %c0_i32_0 = arith.constant 0 : i32
    return %arg0, %c0_i32 : i32, i32
  }
}

</mosaic_0001>

<bundles_post_ra>
// kernel: tpu_custom_call.1
= control target key start
LH: loop header
LB: loop body
LE: loop exit
PB: predicated region body
PF: predicated region fallthrough
CT: control target
= control target key end

     0   :  { %6 = vsyncpa [#allocation3], 0  ;;  %s134_s0 = inlined_call_operand.hbm [shape: f32[16,128], index: 0, kind: input, shape index: {}]   ;;  %s135_s1 = inlined_call_operand.hbm [shape: f32[16,128], index: 1, kind: output, shape index: {}]  }
   0x1   :  { %7 = vsyncpa [#allocation4], 0  ;;  %s96_s6 = smov [#allocation2]   ;;  %s48_s10 = scalar_lea.hbm %s134_s0, 256 }
   0x2   :  { %s13_s7 = sshll.u32 %s96_s6, 4  ;;  %p49_p0 = scmp.ne.s32.totalorder %s134_s0, %s48_s10  ;;  %s14_s7 = int_to_ptr.vmem [resolvable:$true] %s13_s7 }
   0x3   :  { %p52_p1 = scmp.lt.u32.totalorder %s48_s10, %s134_s0 }
   0x5   :  { %p54_p2 = pnand %p52_p1, %p49_p0 }
   0x7   :  { %57 = shalt.err (!%p54_p2)
}
   0x8   :  { %s58_s15 = scalar_lea.vmem %s14_s7, 256  ;;  %p63_p4 = scmp.lt.s32.totalorder %s14_s7, %s14_s7 }
   0x9   :  { %p59_p3 = scmp.ne.s32.totalorder %s14_s7, %s58_s15  ;;  %p64_p5 = scmp.lt.s32.totalorder %s58_s15, %s58_s15 }
   0xb   :  { %p65_p6 = por %p64_p5, %p63_p4 }
   0xd   :  { %p66_p7 = pnand %p65_p6, %p59_p3 }
   0xf   :  { %69 = shalt.err (!%p66_p7)
}
  0x10   :  { %s97_s16 = smov 128   ;;  %s98_s17 = smov 8  }
  0x11   :  { %19 = dma.hbm_to_vmem [thread:$0]  %s134_s0, 256, %s14_s7, [#allocation3], %s97_s16, %s97_s16, %s98_s17  }
  0x12   :  { %92 = dma.done.wait [#allocation3], 256  }
  0x13   :  { %93 = vsyncadd [#allocation3], 4294967040  ;;  %s99_s20 = smov [#allocation5]   ;;  %v23_v0 = vld [vmem:[#allocation2] sm:$0xff]  ;;  %v24_v1 = vld [vmem:[#allocation2 + $0x8] sm:$0xff] }
  0x14   :  { %s32_s21 = sshll.u32 %s99_s20, 4  ;;  %25 = vst [vmem:[#allocation5] sm:$0xff] %v23_v0  ;;  %26 = vst [vmem:[#allocation5 + $0x8] sm:$0xff] %v24_v1  ;;  %s33_s21 = int_to_ptr.vmem [resolvable:$true] %s32_s21 }
  0x15   :  { %s70_s22 = scalar_lea.vmem %s33_s21, 256  ;;  %p75_p9 = scmp.lt.s32.totalorder %s33_s21, %s33_s21 }
  0x16   :  { %p71_p8 = scmp.ne.s32.totalorder %s33_s21, %s70_s22  ;;  %p76_p10 = scmp.lt.s32.totalorder %s70_s22, %s70_s22 }
  0x18   :  { %p77_p11 = por %p76_p10, %p75_p9 }
  0x1a   :  { %p78_p12 = pnand %p77_p11, %p71_p8 }
  0x1c   :  { %81 = shalt.err (!%p78_p12)
}
  0x1d   :  { %s82_s0 = scalar_lea.hbm %s135_s1, 256 }
  0x1e   :  { %p83_p13 = scmp.ne.s32.totalorder %s135_s1, %s82_s0  ;;  %p86_p0 = scmp.lt.u32.totalorder %s82_s0, %s135_s1 }
  0x20   :  { %p88_p1 = pnand %p86_p0, %p83_p13 }
  0x22   :  { %91 = shalt.err (!%p88_p1)
}
  0x23   :  { %38 = dma.vmem_to_hbm [thread:$0]  %s33_s21, 256, %s135_s1, [#allocation4], %s97_s16, %s97_s16, %s98_s17  }
  0x24   :  { %94 = dma.done.wait [#allocation4], 256  }
  0x25   :  { %95 = vsyncadd [#allocation4], 4294967040 }
  0x26   :  { %42 = vsyncpa [#allocation3], 1 }
  0x27   :  { %43 = vsyncpa [#allocation4], 1 }

</bundles_post_ra>
